<compile_context>
chip_gen: v7x
topology: tpu7x:2x2x1
jax: 0.10.0
libtpu: 0.0.40
codegen_flags: <defaults>
</compile_context>

<pallas_src>
import jax
import jax.numpy as jnp
from jax.experimental import pallas as pl
from jax.experimental.pallas import tpu as pltpu

LANE = 128
SUBLANE = 8


def _round_up(x, m):
    return ((x + m - 1) // m) * m


def make_meanpool_mlp_kernel(nlayers):
    """Kernel refs:
      inp_ref  : (TB, N, D)  bf16  -- unpadded activations
      mask_ref : (TB, N, 1)  f32   -- pre-normalized mask (objmask / count)
      wh_ref   : (LH, D, D)  bf16  -- stacked hidden weights, LH = max(nlayers-1, 1)
      bh_ref   : (LH, 1, D)  f32   -- stacked hidden biases
      wl_ref   : (D, KO)     bf16  -- final weight, output zero-padded to KO
      bl_ref   : (1, KO)     f32   -- final bias,   output zero-padded to KO
      out_ref  : (TB, KO)    f32   -- lane-dense output slab
    """

    def kernel(inp_ref, mask_ref, wh_ref, bh_ref, wl_ref, bl_ref, out_ref):
        # Masked mean-pool on the VPU: mask is already divided by the per-row
        # object count, so this is a plain multiply + reduce over the object
        # (sublane) axis.  No MXU use, no (TB,1,P) relayout.
        x = inp_ref[...].astype(jnp.float32)              # (TB, N, D)
        m = mask_ref[...]                                 # (TB, N, 1)
        h = jnp.sum(x * m, axis=1)                        # (TB, D) f32

        # Hidden Linear + ReLU blocks at the true width D (bf16 MXU, f32 acc).
        for i in range(nlayers - 1):
            acc = jnp.dot(h.astype(jnp.bfloat16), wh_ref[i],
                          preferred_element_type=jnp.float32)
            h = jnp.maximum(acc + bh_ref[i], 0.0)         # (1, D) bias broadcast

        # Final Linear into the lane-dense (padded) output width.
        acc = jnp.dot(h.astype(jnp.bfloat16), wl_ref[...],
                      preferred_element_type=jnp.float32)
        out_ref[...] = (acc + bl_ref[...]).astype(out_ref.dtype)

    return kernel


def prepare_params(params):
    """Pack/pad layer params ONCE, outside the per-forward path.

    params: list of (W, b) with W shaped (in, out), b shaped (1, out) or (out,).
    Hidden layers keep their true (D, D) width; only the final layer's output
    dim is zero-padded to a multiple of 128 for lane-dense output stores.
    """
    nlayers = len(params)
    D = params[0][0].shape[0]
    out_features = params[-1][0].shape[1]
    KO = _round_up(out_features, LANE)
    LH = max(nlayers - 1, 1)                  # dummy slot when nlayers == 1

    wh = jnp.zeros((LH, D, D), jnp.float32)
    bh = jnp.zeros((LH, 1, D), jnp.float32)
    for i in range(nlayers - 1):
        w, b = params[i]
        wh = wh.at[i].set(w.astype(jnp.float32))
        bh = bh.at[i, 0].set(jnp.reshape(b, (-1,)).astype(jnp.float32))

    w_last, b_last = params[-1]
    wl = jnp.zeros((D, KO), jnp.float32).at[:, :out_features].set(
        w_last.astype(jnp.float32))
    bl = jnp.zeros((1, KO), jnp.float32).at[0, :out_features].set(
        jnp.reshape(b_last, (-1,)).astype(jnp.float32))

    return {
        "wh": wh.astype(jnp.bfloat16), "bh": bh,
        "wl": wl.astype(jnp.bfloat16), "bl": bl,
        "nlayers": nlayers, "in_features": D,
        "out_features": out_features, "KO": KO,
    }


def _vmem_capacity_bytes():
    # 128 MiB on v5e/v6e, 64 MiB per TensorCore on v7x; conservative fallback
    # if the trace-time query is unavailable.
    try:
        cap = getattr(pltpu.get_tpu_info(), "vmem_capacity_bytes", None)
        if cap:
            return int(cap)
    except Exception:
        pass
    return 64 * 1024 * 1024


def meanpool_mlp(inp, objmask, prepared):
    """inp: (B, N, D) any float dtype; objmask: (B, N); prepared: prepare_params()."""
    B, N, D = inp.shape
    assert D == prepared["in_features"]
    nlayers = prepared["nlayers"]
    KO = prepared["KO"]
    out_features = prepared["out_features"]
    LH = prepared["wh"].shape[0]

    # ---- batch-tile selection (per-generation VMEM budget) -----------------
    # Resident operands (constant index_map: DMA'd once).  Counted twice since
    # the default pipeline still allocates two buffers for them.
    resident = 2 * (LH * D * D * 2 + LH * D * 4 + D * KO * 2 + KO * 4)

    def working_set(tb):
        stream = tb * (N * D * 2 + N * 4 + KO * 4)     # bf16 in, f32 mask/out
        f32_tmp = tb * N * D * 4                       # in-kernel f32 upcast
        return 2 * stream + f32_tmp + resident         # streams double-buffered

    cap = _vmem_capacity_bytes()
    budget = cap // 2

    B8 = _round_up(max(B, 1), SUBLANE)
    TB = min(256, B8)                                  # MXU row fill on v6e/v7x
    while TB > SUBLANE and working_set(TB) > budget:
        TB = max(SUBLANE, _round_up(TB // 2, SUBLANE))  # always a multiple of 8
    # Prefer >= 2 grid steps when the batch allows: both v7x TensorCores get
    # work and the input DMA overlaps compute.
    if B8 > SUBLANE and _round_up(B8, TB) // TB < 2:
        TB = max(SUBLANE, _round_up((B8 + 1) // 2, SUBLANE))
    B_pad = _round_up(B8, TB)

    vmem_limit = int(max(16 << 20, min(working_set(TB) + (8 << 20),
                                       (cap * 3) // 4)))

    # ---- wrapper-side layout prep (cheap XLA ops, NO feature padding) ------
    inp_p = jnp.pad(inp.astype(jnp.bfloat16),
                    ((0, B_pad - B), (0, 0), (0, 0)))            # (B_pad, N, D)

    mask_f32 = objmask.astype(jnp.float32)                        # (B, N)
    counts = jnp.sum(mask_f32, axis=1, keepdims=True)             # (B, 1)
    # No zero-count guard: count == 0 gives 0/0 = NaN, matching the PyTorch
    # module's pooled division semantics exactly.
    mask_norm = mask_f32 / counts
    mask3 = jnp.pad(mask_norm, ((0, B_pad - B), (0, 0)))[:, :, None]  # (B_pad,N,1)

    grid = (B_pad // TB,)
    out_pad = pl.pallas_call(
        make_meanpool_mlp_kernel(nlayers),
        out_shape=jax.ShapeDtypeStruct((B_pad, KO), jnp.float32),
        grid=grid,
        in_specs=[
            pl.BlockSpec((TB, N, D), lambda i: (i, 0, 0)),   # bf16 activations
            pl.BlockSpec((TB, N, 1), lambda i: (i, 0, 0)),   # normalized mask
            pl.BlockSpec((LH, D, D), lambda i: (0, 0, 0)),   # resident hidden W
            pl.BlockSpec((LH, 1, D), lambda i: (0, 0, 0)),   # resident hidden b
            pl.BlockSpec((D, KO), lambda i: (0, 0)),         # resident final W
            pl.BlockSpec((1, KO), lambda i: (0, 0)),         # resident final b
        ],
        out_specs=pl.BlockSpec((TB, KO), lambda i: (i, 0)),  # lane-dense slab
        compiler_params=pltpu.CompilerParams(
            dimension_semantics=("parallel",),
            vmem_limit_bytes=vmem_limit,
        ),
    )(inp_p, mask3, prepared["wh"], prepared["bh"],
      prepared["wl"], prepared["bl"])

    # Slice real batch rows / output columns back out of the padded slab.
    return {"final_outputs": out_pad[:B, :out_features]}


def init_params(key, in_features, out_features, nlayers):
    """Deterministic synthetic init matching the module's layer shapes."""
    params = []
    dims = [(in_features, in_features)] * (nlayers - 1) + [(in_features, out_features)]
    for (fin, fout) in dims:
        key, kw, kb = jax.random.split(key, 3)
        bound = 1.0 / (fin ** 0.5)
        w = jax.random.uniform(kw, (fin, fout), jnp.float32, -bound, bound)
        b = jax.random.uniform(kb, (1, fout), jnp.float32, -bound, bound)
        params.append((w, b))
    return params


def reference(inp, objmask, params):
    """Pure f32 JAX reference matching the PyTorch forward."""
    masked = inp * objmask[:, :, None]
    pooled = masked.sum(axis=1) / objmask.sum(axis=1, keepdims=True)
    h = pooled
    for i, (w, b) in enumerate(params):
        h = h @ w + b
        if i < len(params) - 1:
            h = jnp.maximum(h, 0.0)
    return h


if __name__ == "__main__":
    B, N, D = 2, 8, 32          # batch, MAX_OBJS_IN_BATCH, dim (in_features)
    out_features = 16
    nlayers = 3

    key = jax.random.PRNGKey(0)
    key, k_inp = jax.random.split(key)
    inp = jax.random.normal(k_inp, (B, N, D), jnp.float32)

    # per-batch valid-object counts (all > 0 so the mean never divides by 0)
    counts = jnp.array([5, 8], dtype=jnp.int32)
    objmask = (jnp.arange(N)[None, :] < counts[:, None]).astype(jnp.float32)  # (B, N)

    params = init_params(key, D, out_features, nlayers)
    prepared = prepare_params(params)   # packed/padded once, reused per forward

    logits = meanpool_mlp(inp, objmask, prepared)
    out = jax.block_until_ready(logits["final_outputs"])

    ref = reference(inp, objmask, params)
    assert out.shape == (B, out_features)
    # Tolerance accounts for bf16 activation/weight rounding in the MXU path
    # (f32 accumulation); observed error is ~1e-3.
    assert jnp.allclose(out, ref, atol=2e-2, rtol=2e-2), "mismatch vs reference"

    print("KERNEL_OK")
</pallas_src>

<mosaic_0001>
module attributes {stable_mosaic.version = 11 : i64} {
  func.func @kernel(%arg0: i32, %arg1: memref<8x8x32xbf16, #tpu.memory_space<vmem>>, %arg2: memref<8x8x1xf32, #tpu.memory_space<vmem>>, %arg3: memref<2x32x32xbf16, #tpu.memory_space<vmem>>, %arg4: memref<2x1x32xf32, #tpu.memory_space<vmem>>, %arg5: memref<32x128xbf16, #tpu.memory_space<vmem>>, %arg6: memref<1x128xf32, #tpu.memory_space<vmem>>, %arg7: memref<8x128xf32, #tpu.memory_space<vmem>>) attributes {dimension_semantics = [#tpu.dimension_semantics<parallel>], iteration_bounds = array<i64: 1>, scalar_prefetch = 0 : i64, scratch_operands = 0 : i64, tpu.core_type = #tpu.core_type<tc>, window_params = [{transform_indices = @transform_0, window_bounds = array<i64: 8, 8, 32>}, {transform_indices = @transform_1, window_bounds = array<i64: 8, 8, 1>}, {pipeline_mode = #tpu.pipeline_mode<synchronous>, transform_indices = @transform_2, window_bounds = array<i64: 2, 32, 32>}, {pipeline_mode = #tpu.pipeline_mode<synchronous>, transform_indices = @transform_3, window_bounds = array<i64: 2, 1, 32>}, {pipeline_mode = #tpu.pipeline_mode<synchronous>, transform_indices = @transform_4, window_bounds = array<i64: 32, 128>}, {pipeline_mode = #tpu.pipeline_mode<synchronous>, transform_indices = @transform_5, window_bounds = array<i64: 1, 128>}, {transform_indices = @transform_6, window_bounds = array<i64: 8, 128>}]} {
    %c0 = arith.constant 0 : index
    %c0_0 = arith.constant 0 : index
    %c0_1 = arith.constant 0 : index
    %0 = vector.load %arg1[%c0, %c0_0, %c0_1] : memref<8x8x32xbf16, #tpu.memory_space<vmem>>, vector<8x8x32xbf16>
    %1 = arith.extf %0 : vector<8x8x32xbf16> to vector<8x8x32xf32>
    %c0_2 = arith.constant 0 : index
    %c0_3 = arith.constant 0 : index
    %c0_4 = arith.constant 0 : index
    %2 = vector.load %arg2[%c0_2, %c0_3, %c0_4] : memref<8x8x1xf32, #tpu.memory_space<vmem>>, vector<8x8x1xf32>
    %3 = vector.broadcast %2 : vector<8x8x1xf32> to vector<8x8x32xf32>
    %4 = arith.mulf %1, %3 : vector<8x8x32xf32>
    %cst = arith.constant dense<0.000000e+00> : vector<8x32xf32>
    %5 = vector.multi_reduction <add>, %4, %cst [1] : vector<8x8x32xf32> to vector<8x32xf32>
    %6 = arith.truncf %5 : vector<8x32xf32> to vector<8x32xbf16>
    %c0_5 = arith.constant 0 : index
    %c0_6 = arith.constant 0 : index
    %c0_7 = arith.constant 0 : index
    %7 = vector.load %arg3[%c0_5, %c0_6, %c0_7] : memref<2x32x32xbf16, #tpu.memory_space<vmem>>, vector<1x32x32xbf16>
    %8 = vector.shape_cast %7 : vector<1x32x32xbf16> to vector<32x32xbf16>
    %cst_8 = arith.constant dense<0.000000e+00> : vector<8x32xf32>
    %9 = tpu.matmul %6, %8, %cst_8 {dimension_numbers = #tpu.dot_dimension_numbers<[1], [0], [0], [1], [0, 0, 1, 1], [], []>} : vector<8x32xbf16>, vector<32x32xbf16>, vector<8x32xf32> -> vector<8x32xf32>
    %c0_9 = arith.constant 0 : index
    %c0_10 = arith.constant 0 : index
    %c0_11 = arith.constant 0 : index
    %10 = vector.load %arg4[%c0_9, %c0_10, %c0_11] : memref<2x1x32xf32, #tpu.memory_space<vmem>>, vector<1x1x32xf32>
    %11 = vector.shape_cast %10 : vector<1x1x32xf32> to vector<1x32xf32>
    %12 = vector.broadcast %11 : vector<1x32xf32> to vector<8x32xf32>
    %13 = arith.addf %9, %12 : vector<8x32xf32>
    %cst_12 = arith.constant 0.000000e+00 : f32
    %14 = vector.broadcast %cst_12 : f32 to vector<8x32xf32>
    %15 = arith.maximumf %13, %14 : vector<8x32xf32>
    %16 = arith.truncf %15 : vector<8x32xf32> to vector<8x32xbf16>
    %c1 = arith.constant 1 : index
    %c0_13 = arith.constant 0 : index
    %c0_14 = arith.constant 0 : index
    %17 = vector.load %arg3[%c1, %c0_13, %c0_14] : memref<2x32x32xbf16, #tpu.memory_space<vmem>>, vector<1x32x32xbf16>
    %18 = vector.shape_cast %17 : vector<1x32x32xbf16> to vector<32x32xbf16>
    %cst_15 = arith.constant dense<0.000000e+00> : vector<8x32xf32>
    %19 = tpu.matmul %16, %18, %cst_15 {dimension_numbers = #tpu.dot_dimension_numbers<[1], [0], [0], [1], [0, 0, 1, 1], [], []>} : vector<8x32xbf16>, vector<32x32xbf16>, vector<8x32xf32> -> vector<8x32xf32>
    %c1_16 = arith.constant 1 : index
    %c0_17 = arith.constant 0 : index
    %c0_18 = arith.constant 0 : index
    %20 = vector.load %arg4[%c1_16, %c0_17, %c0_18] : memref<2x1x32xf32, #tpu.memory_space<vmem>>, vector<1x1x32xf32>
    %21 = vector.shape_cast %20 : vector<1x1x32xf32> to vector<1x32xf32>
    %22 = vector.broadcast %21 : vector<1x32xf32> to vector<8x32xf32>
    %23 = arith.addf %19, %22 : vector<8x32xf32>
    %cst_19 = arith.constant 0.000000e+00 : f32
    %24 = vector.broadcast %cst_19 : f32 to vector<8x32xf32>
    %25 = arith.maximumf %23, %24 : vector<8x32xf32>
    %26 = arith.truncf %25 : vector<8x32xf32> to vector<8x32xbf16>
    %c0_20 = arith.constant 0 : index
    %c0_21 = arith.constant 0 : index
    %27 = vector.load %arg5[%c0_20, %c0_21] : memref<32x128xbf16, #tpu.memory_space<vmem>>, vector<32x128xbf16>
    %cst_22 = arith.constant dense<0.000000e+00> : vector<8x128xf32>
    %28 = tpu.matmul %26, %27, %cst_22 {dimension_numbers = #tpu.dot_dimension_numbers<[1], [0], [0], [1], [0, 0, 1, 1], [], []>} : vector<8x32xbf16>, vector<32x128xbf16>, vector<8x128xf32> -> vector<8x128xf32>
    %c0_23 = arith.constant 0 : index
    %c0_24 = arith.constant 0 : index
    %29 = vector.load %arg6[%c0_23, %c0_24] : memref<1x128xf32, #tpu.memory_space<vmem>>, vector<1x128xf32>
    %30 = vector.broadcast %29 : vector<1x128xf32> to vector<8x128xf32>
    %31 = arith.addf %28, %30 : vector<8x128xf32>
    %c0_25 = arith.constant 0 : index
    %c0_26 = arith.constant 0 : index
    %32 = vector.load %arg7[%c0_25, %c0_26] : memref<8x128xf32, #tpu.memory_space<vmem>>, vector<8x128xf32>
    tpu.vector_store %arg7[%c0_25, %c0_26], %31 {strides = array<i32>} : memref<8x128xf32, #tpu.memory_space<vmem>>, vector<8x128xf32>,
    return
  }
  func.func @transform_0(%arg0: i32) -> (i32, i32, i32) {
    %c0_i32 = arith.constant 0 : i32
    %c0_i32_0 = arith.constant 0 : i32
    %c0_i32_1 = arith.constant 0 : i32
    return %arg0, %c0_i32, %c0_i32_0 : i32, i32, i32
  }
  func.func @transform_1(%arg0: i32) -> (i32, i32, i32) {
    %c0_i32 = arith.constant 0 : i32
    %c0_i32_0 = arith.constant 0 : i32
    %c0_i32_1 = arith.constant 0 : i32
    return %arg0, %c0_i32, %c0_i32_0 : i32, i32, i32
  }
  func.func @transform_2(%arg0: i32) -> (i32, i32, i32) {
    %c0_i32 = arith.constant 0 : i32
    %c0_i32_0 = arith.constant 0 : i32
    %c0_i32_1 = arith.constant 0 : i32
    %c0_i32_2 = arith.constant 0 : i32
    return %c0_i32, %c0_i32_0, %c0_i32_1 : i32, i32, i32
  }
  func.func @transform_3(%arg0: i32) -> (i32, i32, i32) {
    %c0_i32 = arith.constant 0 : i32
    %c0_i32_0 = arith.constant 0 : i32
    %c0_i32_1 = arith.constant 0 : i32
    %c0_i32_2 = arith.constant 0 : i32
    return %c0_i32, %c0_i32_0, %c0_i32_1 : i32, i32, i32
  }
  func.func @transform_4(%arg0: i32) -> (i32, i32) {
    %c0_i32 = arith.constant 0 : i32
    %c0_i32_0 = arith.constant 0 : i32
    %c0_i32_1 = arith.constant 0 : i32
    return %c0_i32, %c0_i32_0 : i32, i32
  }
  func.func @transform_5(%arg0: i32) -> (i32, i32) {
    %c0_i32 = arith.constant 0 : i32
    %c0_i32_0 = arith.constant 0 : i32
    %c0_i32_1 = arith.constant 0 : i32
    return %c0_i32, %c0_i32_0 : i32, i32
  }
  func.func @transform_6(%arg0: i32) -> (i32, i32) {
    %c0_i32 = arith.constant 0 : i32
    %c0_i32_0 = arith.constant 0 : i32
    return %arg0, %c0_i32 : i32, i32
  }
}

</mosaic_0001>

<bundles_post_ra>
// kernel: tpu_custom_call.1
= control target key start
LH: loop header
LB: loop body
LE: loop exit
PB: predicated region body
PF: predicated region fallthrough
CT: control target
= control target key end

     0   :  { %v517_v2 = vmov 0   ;;  %s654_s0 = inlined_call_operand.vmem [shape: bf16[8,8,32], index: 0, kind: input, shape index: {}]   ;;  %s655_s1 = inlined_call_operand.vmem [shape: f32[8,8,1], index: 1, kind: input, shape index: {}]   ;;  %s656_s2 = inlined_call_operand.vmem [shape: bf16[2,32,32], index: 2, kind: input, shape index: {}]   ;;  %s657_s3 = inlined_call_operand.vmem [shape: f32[2,1,32], index: 3, kind: input, shape index: {}]   ;;  %s658_s4 = inlined_call_operand.vmem [shape: bf16[32,128], index: 4, kind: input, shape index: {}]   ;;  %s659_s5 = inlined_call_operand.vmem [shape: f32[1,128], index: 5, kind: input, shape index: {}]   ;;  %s660_s6 = inlined_call_operand.hbm [shape: f32[8,128], index: 6, kind: output, shape index: {}]  }
   0x1   :  { %v43_v0 = vld [vmem:[%s655_s1 + $0x10] sm:$0xff]  ;;  %v41_v1 = vld [vmem:[%s655_s1] sm:$0xff]  ;;  %486 = vset.pattern.permute.xlu1 %v517_v2  ;;  %485 = vset.pattern.permute.xlu0 %v517_v2  ;;  %v44_v3 = vld [vmem:[%s655_s1 + $0x18] sm:$0xff] }
   0x2   :  { %61 = vperm.xlu1 %486, %v43_v0   ;;  %51 = vperm.xlu0 %485, %v41_v1   ;;  %v42_v4 = vld [vmem:[%s655_s1 + $0x8] sm:$0xff]  ;;  %v45_v6 = vld [vmem:[%s655_s1 + $0x20] sm:$0xff] }
   0x3   :  { %v46_v5 = vld [vmem:[%s655_s1 + $0x28] sm:$0xff] }
   0x6   :  { %66 = vperm.xlu1 %486, %v44_v3   ;;  %56 = vperm.xlu0 %485, %v42_v4  }
   0x7   :  { %11 = vsyncpa [#allocation3], 0  ;;  %v48_v7 = vld [vmem:[%s655_s1 + $0x38] sm:$0xff]  ;;  %v47_v8 = vld [vmem:[%s655_s1 + $0x30] sm:$0xff]  ;;  %v518_v10 = vmov 0.0   ;;  %vm519_vm0 = vmmov 0  }
   0x8   :  { %v487_v9 = vld [vmem:[%s656_s2] sm:$0xff]   ;;  %457 = vmatprep.subr.bf16.mxu0 %v518_v10  ;;  %465 = vmatprep.subr.bf16.mxu1 %v518_v10  ;;  %v488_v11 = vld [vmem:[%s656_s2 + $0x8] sm:$0xff]   ;;  %vm97_vm1 = vcmask 261120   ;;  %v446_v22 = vld [vmem:[%s654_s0 + $0x10] sm:$0xff]   ;;  %vm189_vm2 = vcmask 1041409   ;;  %vm191_vm3 = vcmask 1042434  }
   0x9   :  { %458 = vmatpush3.bf16.msra.mxu0 %v487_v9  ;;  %461 = vmatprep.mubr.msk.bf16.mxu0 %vm519_vm0, %v518_v10  ;;  %v445_v12 = vld [vmem:[%s654_s0 + $0x8] sm:$0xff]   ;;  %v430_v13 = vld [vmem:[%s654_s0] sm:$0xff]   ;;  %v440_v31 = vunpack.c.h.bf16 %v446_v22  ;;  %v439_v32 = vunpack.c.l.bf16 %v446_v22  ;;  %v447_v35 = vld [vmem:[%s654_s0 + $0x18] sm:$0xff]   ;;  %vm193_vm4 = vcmask 1043459   ;;  %vm195_vm5 = vcmask 1044484   ;;  %s520_s12 = smov [#allocation2]  }
   0xa   :  { %76 = vperm.xlu1 %486, %v46_v5   ;;  %71 = vperm.xlu0 %485, %v45_v6   ;;  %v435_v14 = vunpack.c.l.bf16 %v445_v12  ;;  %v431_v15 = vunpack.c.l.bf16 %v430_v13  ;;  %v436_v20 = vunpack.c.h.bf16 %v445_v12  ;;  %v432_v21 = vunpack.c.h.bf16 %v430_v13 }
   0xb   :  { %459 = vmatprep.subr.bf16.mxu0 %v518_v10  ;;  %469 = vmatprep.mubr.msk.bf16.mxu1 %vm519_vm0, %v518_v10  ;;  %v444_v46 = vunpack.c.h.bf16 %v447_v35  ;;  %v443_v47 = vunpack.c.l.bf16 %v447_v35  ;;  %vm197_vm6 = vcmask 1045509   ;;  %vm199_vm7 = vcmask 1046534  }
   0xc   :  { %vm201_vm8 = vcmask 1047559  }
   0xd   :  { %460 = vmatpush3.bf16.msra.mxu0 %v488_v11 }
   0xe   :  { %86 = vperm.xlu1 %486, %v48_v7   ;;  %81 = vperm.xlu0 %485, %v47_v8  }
   0xf   :  { %473 = vmatprep.subr.bf16.mxu0 %v518_v10 }
  0x81   :  { %v62_v16 = vpop.permute.xlu1 %61  ;;  %v52_v17 = vpop.permute.xlu0 %51 }
  0x82   :  { %v91_v18 = vmul.f32 %v435_v14, %v62_v16  ;;  %v89_v19 = vmul.f32 %v431_v15, %v52_v17 }
  0x84   :  { %v112_v23 = vsel %vm97_vm1, %v91_v18, 0.0  ;;  %v98_v24 = vsel %vm97_vm1, %v89_v19, 0.0 }
  0x85   :  { %v113_v25 = vrot.slane %v112_v23, 4  ;;  %v99_v26 = vrot.slane %v98_v24, 4  ;;  %v67_v27 = vpop.permute.xlu1 %66  ;;  %v57_v28 = vpop.permute.xlu0 %56 }
  0x86   :  { %v92_v29 = vmul.f32 %v436_v20, %v67_v27  ;;  %v90_v30 = vmul.f32 %v432_v21, %v57_v28 }
  0x87   :  { %v114_v33 = vadd.f32 %v113_v25, %v112_v23  ;;  %v100_v34 = vadd.f32 %v99_v26, %v98_v24 }
  0x88   :  { %v119_v36 = vsel %vm97_vm1, %v92_v29, 0.0  ;;  %v105_v37 = vsel %vm97_vm1, %v90_v30, 0.0 }
  0x89   :  { %v115_v38 = vrot.slane %v114_v33, 2  ;;  %v101_v39 = vrot.slane %v100_v34, 2  ;;  %v120_v40 = vrot.slane %v119_v36, 4  ;;  %v106_v41 = vrot.slane %v105_v37, 4  ;;  %v77_v42 = vpop.permute.xlu1 %76  ;;  %v72_v43 = vpop.permute.xlu0 %71 }
  0x8a   :  { %v94_v44 = vmul.f32 %v440_v31, %v77_v42  ;;  %v93_v45 = vmul.f32 %v439_v32, %v72_v43 }
  0x8b   :  { %v116_v48 = vadd.f32 %v115_v38, %v114_v33  ;;  %v102_v49 = vadd.f32 %v101_v39, %v100_v34  ;;  %v121_v50 = vadd.f32 %v120_v40, %v119_v36  ;;  %v107_v51 = vadd.f32 %v106_v41, %v105_v37 }
  0x8c   :  { %v133_v52 = vsel %vm97_vm1, %v94_v44, 0.0  ;;  %v126_v53 = vsel %vm97_vm1, %v93_v45, 0.0 }
  0x8d   :  { %v117_v54 = vrot.slane %v116_v48, 1  ;;  %v103_v55 = vrot.slane %v102_v49, 1  ;;  %v122_v56 = vrot.slane %v121_v50, 2  ;;  %v108_v57 = vrot.slane %v107_v51, 2  ;;  %v87_v58 = vpop.permute.xlu1 %86  ;;  %v82_v59 = vpop.permute.xlu0 %81 }
  0x8e   :  { %v134_v60 = vrot.slane %v133_v52, 4  ;;  %v127_v61 = vrot.slane %v126_v53, 4  ;;  %v96_v62 = vmul.f32 %v444_v46, %v87_v58  ;;  %v95_v63 = vmul.f32 %v443_v47, %v82_v59  ;;  %v490_v58 = vld [vmem:[%s656_s2 + $0x18] sm:$0xff]   ;;  %v491_v59 = vld [vmem:[%s658_s4] sm:$0xff]  }
  0x8f   :  { %v118_v0 = vadd.f32 %v117_v54, %v116_v48  ;;  %v104_v1 = vadd.f32 %v103_v55, %v102_v49  ;;  %v123_v2 = vadd.f32 %v122_v56, %v121_v50  ;;  %v109_v3 = vadd.f32 %v108_v57, %v107_v51  ;;  %v489_v57 = vld [vmem:[%s656_s2 + $0x10] sm:$0xff]  }
  0x90   :  { %v135_v4 = vadd.f32 %v134_v60, %v133_v52  ;;  %v128_v5 = vadd.f32 %v127_v61, %v126_v53  ;;  %v147_v6 = vsel %vm97_vm1, %v96_v62, 0.0  ;;  %v140_v7 = vsel %vm97_vm1, %v95_v63, 0.0  ;;  %466 = vmatpush3.bf16.msra.mxu1 %v489_v57  ;;  %v412_v60 = vld [vmem:[%s657_s3] ss:$0 sm:$0xff] }
  0x91   :  { %v124_v8 = vrot.slane %v123_v2, 1  ;;  %v110_v9 = vrot.slane %v109_v3, 1  ;;  %v148_v13 = vrot.slane %v147_v6, 4  ;;  %v141_v14 = vrot.slane %v140_v7, 4  ;;  %467 = vmatprep.subr.bf16.mxu1 %v518_v10 }
  0x92   :  { %v136_v11 = vrot.slane %v135_v4, 2  ;;  %v129_v12 = vrot.slane %v128_v5, 2  ;;  %v156_v15 = vpack.c.bf16 %v118_v0, %v118_v0  ;;  %v154_v16 = vpack.c.bf16 %v104_v1, %v104_v1 }
  0x93   :  { %v125_v17 = vadd.f32 %v124_v8, %v123_v2  ;;  %v111_v18 = vadd.f32 %v110_v9, %v109_v3  ;;  %v149_v21 = vadd.f32 %v148_v13, %v147_v6  ;;  %v142_v22 = vadd.f32 %v141_v14, %v140_v7  ;;  %v425_v13 = vld [vmem:[%s659_s5] ss:$0 sm:$0xff] }
  0x94   :  { %v137_v19 = vadd.f32 %v136_v11, %v135_v4  ;;  %v130_v20 = vadd.f32 %v129_v12, %v128_v5  ;;  %v183_v29 = vunpack.c.l.b16 %v156_v15  ;;  %v181_v30 = vunpack.c.l.b16 %v154_v16  ;;  %468 = vmatpush3.bf16.msra.mxu1 %v490_v58  ;;  %v492_v4 = vld [vmem:[%s658_s4 + $0x8] sm:$0xff]   ;;  %s404_s4 = sshll.u32 %s520_s12, 4  ;;  %s405_s4 = int_to_ptr.vmem [resolvable:$true] %s404_s4 }
  0x95   :  { %v157_v23 = vpack.c.bf16 %v125_v17, %v125_v17  ;;  %v155_v24 = vpack.c.bf16 %v111_v18, %v111_v18  ;;  %v150_v27 = vrot.slane %v149_v21, 2  ;;  %v143_v28 = vrot.slane %v142_v22, 2  ;;  %p498_p1 = scmp.lt.s32.totalorder %s405_s4, %s405_s4 }
  0x96   :  { %v138_v25 = vrot.slane %v137_v19, 1  ;;  %v131_v26 = vrot.slane %v130_v20, 1 }
  0x97   :  { %v182_v31 = vunpack.c.l.b16 %v155_v24  ;;  %v151_v34 = vadd.f32 %v150_v27, %v149_v21  ;;  %v144_v35 = vadd.f32 %v143_v28, %v142_v22  ;;  %v184_v36 = vunpack.c.l.b16 %v157_v23 }
  0x98   :  { %v139_v32 = vadd.f32 %v138_v25, %v137_v19  ;;  %v132_v33 = vadd.f32 %v131_v26, %v130_v20 }
  0x99   :  { %v190_v37 = vsel %vm189_vm2, %v182_v31, %v181_v30  ;;  %v152_v41 = vrot.slane %v151_v34, 1  ;;  %v145_v42 = vrot.slane %v144_v35, 1 }
  0x9a   :  { %v192_v38 = vsel %vm191_vm3, %v183_v29, %v190_v37  ;;  %v159_v39 = vpack.c.bf16 %v139_v32, %v139_v32  ;;  %v158_v40 = vpack.c.bf16 %v132_v33, %v132_v33 }
  0x9b   :  { %v194_v44 = vsel %vm193_vm4, %v184_v36, %v192_v38  ;;  %v153_v45 = vadd.f32 %v152_v41, %v151_v34  ;;  %v146_v46 = vadd.f32 %v145_v42, %v144_v35 }
  0x9c   :  { %v185_v43 = vunpack.c.l.b16 %v158_v40  ;;  %v186_v47 = vunpack.c.l.b16 %v159_v39 }
  0x9d   :  { %v161_v48 = vpack.c.bf16 %v153_v45, %v153_v45  ;;  %v160_v50 = vpack.c.bf16 %v146_v46, %v146_v46 }
  0x9e   :  { %v196_v49 = vsel %vm195_vm5, %v185_v43, %v194_v44 }
  0x9f   :  { %v188_v51 = vunpack.c.l.b16 %v161_v48  ;;  %v187_v52 = vunpack.c.l.b16 %v160_v50  ;;  %v198_v53 = vsel %vm197_vm6, %v186_v47, %v196_v49 }
  0xa1   :  { %v200_v54 = vsel %vm199_vm7, %v187_v52, %v198_v53 }
  0xa2   :  { %v202_v55 = vsel %vm201_vm8, %v188_v51, %v200_v54 }
  0xa3   :  { %v203_v56 = vpack.c.b16 %v202_v55, %v202_v55 }
  0xa5   :  { %462 = vmatmul.mubr.msk.bf16.vlgmr.msra.gmra.mrb[0].mxu0 %vm97_vm1, %v203_v56 }
  0xa6   :  { %477 = vmatprep.mubr.msk.bf16.mxu0 %vm519_vm0, %v518_v10  ;;  %474 = vmatpush3.bf16.msra.mxu0 %v491_v59 }
  0xa7   :  { %475 = vmatprep.subr.bf16.mxu0 %v518_v10  ;;  %v421_v10 = vld [vmem:[%s657_s3 + $0x1] ss:$0 sm:$0xff]  ;;  %s493_s3 = scalar_lea.vmem %s405_s4, 128 }
  0xa8   :  { %p494_p0 = scmp.ne.s32.totalorder %s405_s4, %s493_s3  ;;  %p499_p2 = scmp.lt.s32.totalorder %s493_s3, %s493_s3 }
  0xaa   :  { %476 = vmatpush3.bf16.msra.mxu0 %v492_v4  ;;  %p500_p3 = por %p499_p2, %p498_p1 }
  0xac   :  { %p501_p4 = pnand %p500_p3, %p494_p0 }
 0x178   :  { %v253_v61 = vpop.f32.mrb[0].mxu0 }
 0x179   :  { %v254_v62 = vadd.f32 %v412_v60, %v253_v61  ;;  %v463_v63 = vpop.f32.mrb[1].mxu0 }
 0x17a   :  { %v256_v0 = vpop.f32.mrb[2].mxu0 }
 0x17b   :  { %v259_v1 = vmax.f32 %v254_v62, 0.0  ;;  %v464_v2 = vpop.f32.mrb[3].mxu0 }
 0x17d   :  { %v260_v3 = vpack.c.bf16 %v259_v1, %v259_v1 }
 0x17f   :  { %470 = vmatmul.mubr.msk.bf16.vlgmr.msra.gmra.mrb[0].mxu1 %vm97_vm1, %v260_v3 }
 0x252   :  { %v323_v5 = vpop.f32.mrb[0].mxu1 }
 0x253   :  { %v324_v6 = vadd.f32 %v421_v10, %v323_v5  ;;  %v471_v7 = vpop.f32.mrb[1].mxu1 }
 0x254   :  { %v326_v8 = vpop.f32.mrb[2].mxu1 }
 0x255   :  { %v329_v9 = vmax.f32 %v324_v6, 0.0  ;;  %v472_v11 = vpop.f32.mrb[3].mxu1 }
 0x257   :  { %v330_v12 = vpack.c.bf16 %v329_v9, %v329_v9 }
 0x259   :  { %478 = vmatmul.mubr.msk.bf16.vlgmr.msra.gmra.mrb[4].mxu0 %vm97_vm1, %v330_v12 }
 0x32c   :  { %v391_v14 = vpop.f32.mrb[4].mxu0 }
 0x32d   :  { %v392_v15 = vadd.f32 %v425_v13, %v391_v14  ;;  %v479_v16 = vpop.f32.mrb[5].mxu0 }
 0x32e   :  { %v394_v17 = vpop.f32.mrb[6].mxu0 }
 0x32f   :  { %397 = vst [vmem:[#allocation2] sm:$0xff] %v392_v15  ;;  %v480_v18 = vpop.f32.mrb[7].mxu0 }
 0x330   :  { %504 = shalt.err (!%p501_p4)
}
 0x331   :  { %s505_s5 = scalar_lea.hbm %s660_s6, 128 }
 0x332   :  { %p506_p5 = scmp.ne.s32.totalorder %s660_s6, %s505_s5  ;;  %p509_p6 = scmp.lt.u32.totalorder %s505_s5, %s660_s6 }
 0x334   :  { %p511_p7 = pnand %p509_p6, %p506_p5 }
 0x336   :  { %514 = shalt.err (!%p511_p7)
}
 0x337   :  { %407 = dma.vmem_to_hbm [thread:$0]  %s405_s4, 128, %s660_s6, [#allocation3]  }
 0x338   :  { %515 = dma.done.wait [#allocation3], 128  }
 0x339   :  { %516 = vsyncadd [#allocation3], 4294967168 }
 0x33a   :  { %411 = vsyncpa [#allocation3], 1 }

</bundles_post_ra>
